<compile_context>
chip_gen: v7x
topology: tpu7x:2x2x1
jax: 0.10.0
libtpu: 0.0.40
codegen_flags: <defaults>
</compile_context>

<pallas_src>
import jax
import jax.numpy as jnp
from jax.experimental import pallas as pl
from jax.experimental.pallas import tpu as pltpu


def _round_up(x: int, m: int) -> int:
    return ((x + m - 1) // m) * m


def _vmem_capacity_bytes() -> int:
    """Physical per-core VMEM; conservative (v7x) fallback when not queryable."""
    try:
        info = pltpu.get_tpu_info()
        cap = int(getattr(info, "vmem_capacity_bytes", 0) or 0)
        if cap > 0:
            return cap
    except Exception:
        pass
    return 64 * 1024 * 1024


def _largest_divisor_tile(total: int, max_tile: int) -> int:
    """Largest multiple of 128 that divides `total` (a 128-multiple) and is <= max_tile."""
    max_tile = max(128, (max_tile // 128) * 128)
    for cand in range(max_tile, 127, -128):
        if total % cand == 0:
            return cand
    return 128


def _subject_layers_kernel(subjects_ref, x_ref, w_ref, o_ref):
    # subjects_ref: SMEM (B,) int32 — consumed only by the weights index_map.
    # x_ref: (1, C, Tt)    w_ref: (1, D, C)    o_ref: (1, D, Tt)
    w = w_ref[0]                                   # (D, C) — resident across the T loop
    x = x_ref[0]                                   # (C, Tt)
    out = jnp.dot(w, x, preferred_element_type=jnp.float32)   # (D, Tt) on the MXU
    o_ref[0] = out.astype(o_ref.dtype)


def subject_layers(x, subjects, weights, *, compute_dtype=None, max_t_tile: int = 2048):
    """x: (B, C, T), subjects: (B,) int, weights: (S, C, D) -> (B, D, T)."""
    B, C, T = x.shape
    S, Cw, D = weights.shape
    assert Cw == C, (Cw, C)

    if compute_dtype is not None:
        x = x.astype(compute_dtype)
        weights = weights.astype(compute_dtype)
    dtype = x.dtype
    iz = jnp.dtype(dtype).itemsize

    # One-time XLA-side transpose: (S, C, D) -> (S, D, C) so the kernel matmul
    # contracts lhs lanes against rhs sublanes (canonical MXU feed).
    w_t = jnp.transpose(weights, (0, 2, 1))

    # Guard against out-of-range subject ids (would otherwise DMA OOB).
    # NOTE: this silently clamps instead of raising like PyTorch indexing would.
    subjects = jnp.clip(subjects.astype(jnp.int32), 0, S - 1)

    # --- VMEM budget (per-chip) and T-tile selection ------------------------
    budget = (_vmem_capacity_bytes() * 3) // 4          # ~48 MiB v7x, ~96 MiB v5e/v6e
    w_block_bytes = C * D * iz

    avail = budget - 2 * w_block_bytes
    if avail <= 0:
        avail = budget // 2
    t_max = avail // (2 * iz * (C + D))                  # double-buffered x + out blocks
    t_max = max(128, min(int(t_max), int(max_t_tile)))

    want_split = (B == 1 and T >= 256)                   # keep both v7x TCs busy
    if T <= t_max and not want_split:
        # Single T tile covering the whole axis: block dim == full dim, no padding.
        t_tile, n_t, Tp = T, 1, T
    else:
        Tp = _round_up(T, 128)
        cap = t_max
        if want_split:
            cap = min(cap, max(128, Tp // 2))
        t_tile = _largest_divisor_tile(Tp, cap)
        n_t = Tp // t_tile

    if Tp != T:  # pad only T, by < 128 columns; zeros keep the contraction exact.
        x = jnp.pad(x, ((0, 0), (0, 0), (0, Tp - T)))

    # Single-buffer large weight blocks: their block index only changes with b,
    # so the one un-overlapped DMA per batch step is amortized over n_t iterations.
    single_buffer_w = (w_block_bytes > (2 << 20)) and (n_t > 1)
    w_spec_kwargs = {"pipeline_mode": pl.Buffered(1)} if single_buffer_w else {}

    grid_spec = pltpu.PrefetchScalarGridSpec(
        num_scalar_prefetch=1,
        grid=(B, n_t),
        in_specs=[
            # x: one (C, t_tile) slab per (b, t) step; C is the full dim.
            pl.BlockSpec((1, C, t_tile), lambda b, t, subj: (b, 0, t)),
            # weights: per-subject (D, C) slice; ignores t so it stays resident.
            pl.BlockSpec((1, D, C), lambda b, t, subj: (subj[b], 0, 0),
                         **w_spec_kwargs),
        ],
        out_specs=pl.BlockSpec((1, D, t_tile), lambda b, t, subj: (b, 0, t)),
    )

    # Cost estimate over the work actually performed (all ints).
    flops = int(2 * B * C * D * Tp)
    bytes_accessed = int(iz * (B * C * Tp + B * C * D + B * D * Tp))
    cost = pl.CostEstimate(flops=flops, transcendentals=0,
                           bytes_accessed=bytes_accessed)

    w_buffers = 1 if single_buffer_w else 2
    block_bytes = iz * (2 * C * t_tile + 2 * D * t_tile + w_buffers * C * D)
    vmem_limit = int(min(budget, max(2 * block_bytes, 32 * 1024 * 1024)))

    out = pl.pallas_call(
        _subject_layers_kernel,
        out_shape=jax.ShapeDtypeStruct((B, D, Tp), dtype),
        grid_spec=grid_spec,
        compiler_params=pltpu.CompilerParams(
            dimension_semantics=("parallel", "parallel"),
            vmem_limit_bytes=vmem_limit,
        ),
        cost_estimate=cost,
    )(subjects, x, w_t)

    if Tp != T:
        out = out[:, :, :T]
    return out


if __name__ == "__main__":
    # Small shapes consistent with the module's forward.
    B, C, D, T, S = 2, 4, 8, 16, 3

    key = jax.random.PRNGKey(0)
    k_w, k_x, k_s = jax.random.split(key, 3)

    # Deterministic init, matching nn.Parameter(randn(S,C,D)) * 1/sqrt(C).
    weights = jax.random.normal(k_w, (S, C, D), dtype=jnp.float32) * (1.0 / C ** 0.5)
    x = jax.random.normal(k_x, (B, C, T), dtype=jnp.float32)
    subjects = jax.random.randint(k_s, (B,), 0, S, dtype=jnp.int32)

    out = jax.block_until_ready(subject_layers(x, subjects, weights))
    ref = jnp.einsum("bct,bcd->bdt", x, weights[subjects])
    assert out.shape == (B, D, T), out.shape
    assert jnp.allclose(out, ref, atol=1e-5, rtol=1e-5), float(jnp.max(jnp.abs(out - ref)))

    # Second check: B == 1 with an unaligned T exercises padding + T-tiling +
    # the forced megacore split path.
    B2, T2 = 1, 300
    x2 = jax.random.normal(jax.random.PRNGKey(1), (B2, C, T2), dtype=jnp.float32)
    subjects2 = jnp.array([2], dtype=jnp.int32)
    out2 = jax.block_until_ready(subject_layers(x2, subjects2, weights))
    ref2 = jnp.einsum("bct,bcd->bdt", x2, weights[subjects2])
    assert out2.shape == (B2, D, T2), out2.shape
    assert jnp.allclose(out2, ref2, atol=1e-5, rtol=1e-5), float(jnp.max(jnp.abs(out2 - ref2)))

    print("KERNEL_OK")
</pallas_src>

<mosaic_0001>
module attributes {stable_mosaic.version = 11 : i64} {
  func.func @_subject_layers_kernel(%arg0: i32, %arg1: i32, %arg2: memref<2xi32, #tpu.memory_space<smem>>, %arg3: memref<1x4x16xf32, #tpu.memory_space<vmem>>, %arg4: memref<1x8x4xf32, #tpu.memory_space<vmem>>, %arg5: memref<1x8x16xf32, #tpu.memory_space<vmem>>) attributes {dimension_semantics = [#tpu.dimension_semantics<parallel>, #tpu.dimension_semantics<parallel>], iteration_bounds = array<i64: 2, 1>, scalar_prefetch = 1 : i64, scratch_operands = 0 : i64, tpu.core_type = #tpu.core_type<tc>, window_params = [{transform_indices = @transform_0, window_bounds = array<i64: 1, 4, 16>}, {transform_indices = @transform_1, window_bounds = array<i64: 1, 8, 4>}, {transform_indices = @transform_2, window_bounds = array<i64: 1, 8, 16>}]} {
    %c0 = arith.constant 0 : index
    %c0_0 = arith.constant 0 : index
    %c0_1 = arith.constant 0 : index
    %0 = vector.load %arg4[%c0, %c0_0, %c0_1] : memref<1x8x4xf32, #tpu.memory_space<vmem>>, vector<1x8x4xf32>
    %1 = vector.shape_cast %0 : vector<1x8x4xf32> to vector<8x4xf32>
    %c0_2 = arith.constant 0 : index
    %c0_3 = arith.constant 0 : index
    %c0_4 = arith.constant 0 : index
    %2 = vector.load %arg3[%c0_2, %c0_3, %c0_4] : memref<1x4x16xf32, #tpu.memory_space<vmem>>, vector<1x4x16xf32>
    %3 = vector.shape_cast %2 : vector<1x4x16xf32> to vector<4x16xf32>
    %cst = arith.constant dense<0.000000e+00> : vector<8x16xf32>
    %4 = tpu.matmul %1, %3, %cst {dimension_numbers = #tpu.dot_dimension_numbers<[1], [0], [0], [1], [0, 0, 1, 1], [], []>} : vector<8x4xf32>, vector<4x16xf32>, vector<8x16xf32> -> vector<8x16xf32>
    %c0_5 = arith.constant 0 : index
    %c0_6 = arith.constant 0 : index
    %c0_7 = arith.constant 0 : index
    %5 = vector.load %arg5[%c0_5, %c0_6, %c0_7] : memref<1x8x16xf32, #tpu.memory_space<vmem>>, vector<1x8x16xf32>
    %6 = vector.shape_cast %5 : vector<1x8x16xf32> to vector<8x16xf32>
    %7 = vector.shape_cast %4 : vector<8x16xf32> to vector<1x8x16xf32>
    tpu.vector_store %arg5[%c0_5, %c0_6, %c0_7], %7 {strides = array<i32>} : memref<1x8x16xf32, #tpu.memory_space<vmem>>, vector<1x8x16xf32>,
    return
  }
  func.func @transform_0(%arg0: i32, %arg1: i32, %arg2: memref<2xi32, #tpu.memory_space<smem>>) -> (i32, i32, i32) {
    %c0_i32 = arith.constant 0 : i32
    %c0_i32_0 = arith.constant 0 : i32
    return %arg0, %c0_i32, %arg1 : i32, i32, i32
  }
  func.func @transform_1(%arg0: i32, %arg1: i32, %arg2: memref<2xi32, #tpu.memory_space<smem>>) -> (i32, i32, i32) {
    %0 = arith.index_cast %arg0 : i32 to index
    %1 = memref.load %arg2[%0] : memref<2xi32, #tpu.memory_space<smem>>
    %c0_i32 = arith.constant 0 : i32
    %c0_i32_0 = arith.constant 0 : i32
    %c0_i32_1 = arith.constant 0 : i32
    return %1, %c0_i32, %c0_i32_0 : i32, i32, i32
  }
  func.func @transform_2(%arg0: i32, %arg1: i32, %arg2: memref<2xi32, #tpu.memory_space<smem>>) -> (i32, i32, i32) {
    %c0_i32 = arith.constant 0 : i32
    %c0_i32_0 = arith.constant 0 : i32
    return %arg0, %c0_i32, %arg1 : i32, i32, i32
  }
}

</mosaic_0001>

<bundles_post_ra>
// kernel: tpu_custom_call.1
= control target key start
LH: loop header
LB: loop body
LE: loop exit
PB: predicated region body
PF: predicated region fallthrough
CT: control target
= control target key end

     0   :  { %s691_s0 = inlined_call_operand.vmem [shape: s32[2], index: 0, kind: input, shape index: {}]   ;;  %s692_s1 = inlined_call_operand.vmem [shape: f32[2,4,16], index: 1, kind: input, shape index: {}]   ;;  %s693_s2 = inlined_call_operand.vmem [shape: f32[3,8,4], index: 2, kind: input, shape index: {}]   ;;  %s694_s3 = inlined_call_operand.hbm [shape: f32[2,8,16], index: 3, kind: output, shape index: {}]  }
   0x1   :  { %s8_s14 = sshll.u32 %s691_s0, 4  ;;  %s9_s14 = int_to_ptr.vmem [resolvable:$true] %s8_s14 }
   0x2   :  { %s454_s15 = scalar_lea.vmem %s9_s14, 16  ;;  %p459_p1 = scmp.lt.s32.totalorder %s9_s14, %s9_s14 }
   0x3   :  { %p455_p0 = scmp.ne.s32.totalorder %s9_s14, %s454_s15  ;;  %p460_p2 = scmp.lt.s32.totalorder %s454_s15, %s454_s15 }
   0x5   :  { %p461_p3 = por %p460_p2, %p459_p1 }
   0x7   :  { %p462_p4 = pnand %p461_p3, %p455_p0 }
   0x9   :  { %465 = shalt.err (!%p462_p4)  }
   0xa   :  { %s548_s16 = smov [#allocation3]  }
   0xb   :  { %11 = dma.vmem_to_smem %s9_s14, 16, %s548_s16, [#allocation2] }
   0xc   :  { %518 = dma.done.wait [#allocation2], 16 }
   0xd   :  { %519 = vsyncadd [#allocation2], 4294967280 }
   0xe   :  { %13 = sfence }
   0xf   :  { %14 = vsyncpa [#allocation5], 0 }
  0x10   :  { %16 = vsyncpa [#allocation5 + $0x1], 0  ;;  %s575_s17 = smov 0   ;;  %s577_s18 = smov 0  }
  0x11   :  { %s579_s0 = smov 0   ;;  %s581_s19 = smov 0  }
  0x12   :  { %s583_s20 = smov 0   ;;  %s585_s21 = smov 0  }
  0x13 LB: > { %s375_s22 = sadd.s32 4294967295, %s546_s21   ;;  %s376_s23 = sadd.s32 4294967294, %s546_s21   ;;  %s546_s21 = sphi %s585_s21, %s22_s21   ;;  %s542_s20 = sphi %s583_s20, %s701_s20   ;;  %s538_s19 = sphi %s581_s19, %s700_s19   ;;  %s534_s0 = sphi %s579_s0, %s699_s0   ;;  %s530_s18 = sphi %s577_s18, %s698_s18   ;;  %s526_s17 = sphi %s575_s17, %s697_s17  }
  0x14   : > { %s34_s24 = sadd.s32 1, %s542_s20  ;;  %s99_s25 = sadd.s32 1, %s534_s0 }
  0x15   : > { %p36_p5 = scmp.ge.s32.totalorder %s34_s24, 2  ;;  %p109_p6 = scmp.ne.s32.totalorder %s534_s0, %s530_s18 }
  0x16   : > { %p110_p7 = scmp.eq.s32.totalorder %s375_s22, 1  ;;  %p115_p8 = scmp.ne.s32.totalorder %s530_s18, %s526_s17 }
  0x17   : > { %s703_s24 = smov (%p36_p5, %s34_s24), 0  ;;  %p116_p10 = scmp.eq.s32.totalorder %s376_s23, 1 }
  0x18   : > { %p615_p9 = por %p110_p7, %p109_p6  ;;  %s94_s27 = ssub.s32 %s542_s20, %s703_s24 }
  0x19   : > { %p379_p11 = scmp.ge.s32.totalorder %s546_s21, 1  ;;  %p97_p12 = scmp.eq.s32.totalorder %s94_s27, 0 }
  0x1a   : > { %p622_p13 = por %p116_p10, %p115_p8  ;;  %p153_p0 = scmp.lt.s32.totalorder %s546_s21, 3 }
  0x1b   : > { %s628_s29 = scalar_select %p97_p12, %s534_s0, %s99_s25  }
  0x1c   : > { %p154_p1 = pnand %p379_p11, %p153_p0 }
  0x1d   : > { %p182_p2 = scmp.lt.s32.totalorder (!%p154_p1), %s538_s19, 1  ;;  %s189_s30 = sld [smem:[#allocation3 + %s538_s19]] (!%p154_p1)  ;;  %v549_v0 = vmov (!%p154_p1), 0.0   ;;  %vm550_vm0 = vmmov (!%p154_p1), 0   ;;  %vm201_vm1 = vcmask (!%p154_p1), 1043456   ;;  %vm197_vm2 = vcmask (!%p154_p1), 31744  }
  0x1e   : > { %157 = sbr.rel (%p154_p1) target bundleno = 269 (0x10d), region = 28  ;;  %391 = vmatprep.subr.mxu0 (!%p154_p1), %v549_v0  ;;  %393 = vmatprep.mubr.msk.f32.mxu0 (!%p154_p1), %vm550_vm0, %v549_v0  ;;  %s179_s13 = sand.u32 (!%p154_p1), 1, %s530_s18   ;;  %vm275_vm3 = vcmask (!%p154_p1), 130048  }
  0x1f   : > { %s380_s14 = sshll.u32 (!%p154_p1), %s179_s13, 3  ;;  %s386_s15 = sshll.u32 (!%p154_p1), %s538_s19, 7 }
  0x20   : > { %s181_s16 = scalar_lea.vmem (!%p154_p1), [#allocation4], %s380_s14  ;;  %s644_s27 = scalar_lea.hbm (!%p154_p1), %s694_s3, %s386_s15 }
  0x21   : > { %s292_s22 = sshll.u32 (!%p154_p1), %s181_s16, 4  ;;  %s646_s22 = int_to_ptr.vmem [resolvable:$true] %s292_s22 }
  0x23   : > { %p190_p3 = scmp.lt.s32.totalorder (!%p154_p1), %s189_s30, 2 }
  0x25   : > { %s183_s4 = scalar_select %p182_p2, %s538_s19, 1 }
  0x26   : > { %s705_s30 = smov (!%p190_p3, %s189_s30), 2  ;;  %s551_s19 = smov [#allocation4]  }
  0x27   : > { %s381_s5 = sshll.u32 %s183_s4, 2  ;;  %s382_s9 = sshll.u32 %s705_s30, 3 }
  0x28   : > { %s188_s8 = scalar_lea.vmem %s692_s1, %s381_s5  ;;  %s193_s12 = scalar_lea.vmem %s693_s2, %s382_s9 }
  0x29   : > { %v196_v1 = vld [vmem:[%s188_s8] sm:$0xf]  ;;  %s278_s30 = scalar_lea.sflag [#allocation5], %s179_s13  ;;  %s466_s4 = scalar_lea.vmem %s646_s22, 128 }
  0x2a   : > { %392 = vmatpush3.msk.msra.mxu0 %vm201_vm1, %v196_v1  ;;  %v195_v2 = vld [vmem:[%s193_s12] sm:$0xff]  ;;  %p467_p4 = scmp.ne.s32.totalorder %s646_s22, %s466_s4  ;;  %s470_s5 = sshll.u32 %s551_s19, 4  ;;  %s471_s5 = int_to_ptr.vmem [resolvable:$false] %s470_s5 }
  0x2b   : > { %394 = vmatmul.mubr.msk.f32.vlgmr.msra.gmra.mrb[0].mxu0 %vm197_vm2, %v195_v2  ;;  %s472_s6 = scalar_lea.vmem %s471_s5, 256  ;;  %p473_p7 = scmp.lt.s32.totalorder %s646_s22, %s471_s5 }
  0x2c   : > { %p468_p5 = pnand %p467_p4, %p615_p9  ;;  %p474_p8 = scmp.lt.s32.totalorder %s472_s6, %s466_s4 }
  0x2e   : > { %p469_p6 = pneg %p468_p5  ;;  %p475_p10 = por %p474_p8, %p473_p7 }
  0x30   : > { %p476_p11 = pnand %p475_p10, %p469_p6 }
  0xfe   : > { %v271_v3 = vpop.f32.mrb[0].mxu0 }
  0xff   : > { %276 = vst.msk [vmem:[%s181_s16] sm:$0xff] %vm275_vm3, %v271_v3  ;;  %v395_v4 = vpop.f32.mrb[1].mxu0 }
 0x100   : > { %479 = shalt.err (!%p476_p11)
}
 0x101   : > { %s480_s7 = scalar_lea.hbm %s644_s27, 128  ;;  %s484_s10 = scalar_lea.hbm %s694_s3, 256 }
 0x102   : > { %p481_p12 = scmp.ne.s32.totalorder %s644_s27, %s480_s7  ;;  %p485_p2 = scmp.lt.u32.totalorder %s644_s27, %s694_s3 }
 0x103   : > { %p486_p3 = scmp.lt.u32.totalorder %s484_s10, %s480_s7  ;;  %p488_p5 = scmp.lt.u32.totalorder %s480_s7, %s644_s27 }
 0x104   : > { %p482_p0 = pnand %p481_p12, %p615_p9 }
 0x105   : > { %p487_p4 = por %p486_p3, %p485_p2 }
 0x106   : > { %p483_p1 = pneg %p482_p0 }
 0x107   : > { %p489_p6 = por %p488_p5, %p487_p4 }
 0x109   : > { %p490_p7 = pnand %p489_p6, %p483_p1 }
 0x10b   : > { %493 = shalt.err (!%p490_p7)
}
 0x10c   : > { %396 = dma.vmem_to_hbm [thread:$0]  (%p615_p9), %s646_s22, 128, %s644_s27, %s278_s30  }
 0x10d PF: > { %p402_p8 = scmp.ge.s32.totalorder %s546_s21, 2  ;;  %s304_s13 = sand.u32 1, %s526_s17  }
 0x10e   : > { %s305_s14 = scalar_lea.sflag [#allocation5], %s304_s13 }
 0x10f   : > { %p399_p10 = pnand %p402_p8, %p622_p13 }
 0x111   : > { %521 = dma.done.wait (!%p399_p10), %s305_s14, 128  }
 0x112   : > { %523 = vsyncadd (!%p399_p10), %s305_s14, 4294967168  ;;  %s22_s21 = sadd.s32 1, %s546_s21   ;;  %s697_s17 = smov %s530_s18 }
 0x113   : > { %p19_p11 = scmp.ge.s32.totalorder %s22_s21, 4   ;;  %s698_s18 = smov %s534_s0 }
 0x114   : > { %s699_s0 = smov %s628_s29  ;;  %s700_s19 = smov %s542_s20 }
 0x115   : > { %s701_s20 = smov %s703_s24  ;;  %21 = sbr.rel (!%p19_p11) target bundleno = 19 (0x13), region = 66 }
 0x11c   :  { %310 = vsyncpa [#allocation5], 1 }
 0x11d   :  { %312 = vsyncpa [#allocation5 + $0x1], 1 }

</bundles_post_ra>
